<compile_context>
chip_gen: v7x
topology: tpu7x:2x2x1
jax: 0.10.0
libtpu: 0.0.40
codegen_flags: <defaults>
</compile_context>

<pallas_src>
import jax
import jax.numpy as jnp
from jax.experimental import pallas as pl
from jax.experimental.pallas import tpu as pltpu

_LANE = 128      # vreg lane width (last dim)
_SUBLANE = 8     # vreg sublane width (second-to-last dim)


def _round_up(n, m):
    return ((n + m - 1) // m) * m


def _pad2d(a, rows, cols):
    return jnp.pad(a, ((0, rows - a.shape[0]), (0, cols - a.shape[1])))


def mlp_kernel(x_ref, w1_ref, b1_ref, w2_ref, b2_ref, w3_ref, b3_ref, o_ref):
    x = x_ref[...]

    # layer_1 + ReLU   (K is tiny; MXU is underutilized here but negligible overall)
    h1 = jnp.dot(x, w1_ref[...], preferred_element_type=jnp.float32) + b1_ref[...]
    h1 = jnp.maximum(h1, 0.0)

    # layer_2 + ReLU
    h2 = jnp.dot(h1, w2_ref[...], preferred_element_type=jnp.float32) + b2_ref[...]
    h2 = jnp.maximum(h2, 0.0)

    # output_layer (no activation) — lane-dense (padded to 128) store
    out = jnp.dot(h2, w3_ref[...], preferred_element_type=jnp.float32) + b3_ref[...]
    o_ref[...] = out.astype(o_ref.dtype)


def pad_params(params):
    """Zero-pad weights/biases to (8,128)-aligned shapes (do once, at init time)."""
    w1, b1, w2, b2, w3, b3 = params
    d_in, h1 = w1.shape
    h2 = w2.shape[1]
    d_out = w3.shape[1]
    d_in_p = _round_up(d_in, _LANE)
    h1_p = _round_up(h1, _LANE)
    h2_p = _round_up(h2, _LANE)
    d_out_p = _round_up(d_out, _LANE)
    return (
        _pad2d(w1, d_in_p, h1_p), _pad2d(b1, 1, h1_p),
        _pad2d(w2, h1_p, h2_p),   _pad2d(b2, 1, h2_p),
        _pad2d(w3, h2_p, d_out_p), _pad2d(b3, 1, d_out_p),
    )


def mlp_forward(x, params, *, block_b=None, max_block_b=512):
    """Run the 3-layer MLP with a Pallas kernel.

    `params` are the logical (PyTorch-shaped, transposed) weights/biases; they
    are zero-padded to 128-lane tiles here (identical math).  `block_b` is the
    batch tile; by default the whole (8-padded) batch runs in a single grid
    step up to `max_block_b` rows.  On v7x, pass block_b = B//2 to give each of
    the two TensorCores one substantial tile.
    """
    B, d_in = x.shape
    d_out = params[5].shape[1]          # logical output width (pre-padding)

    w1p, b1p, w2p, b2p, w3p, b3p = pad_params(params)
    d_in_p, h1_p = w1p.shape
    h2_p = w2p.shape[1]
    d_out_p = w3p.shape[1]

    if block_b is None:
        block_b = min(max_block_b, _round_up(B, _SUBLANE))
    block_b = _round_up(block_b, _SUBLANE)
    B_pad = _round_up(B, block_b)

    x_p = _pad2d(x, B_pad, d_in_p)

    grid = (B_pad // block_b,)

    out_p = pl.pallas_call(
        mlp_kernel,
        out_shape=jax.ShapeDtypeStruct((B_pad, d_out_p), x.dtype),
        grid_spec=pltpu.PrefetchScalarGridSpec(
            num_scalar_prefetch=0,
            grid=grid,
            in_specs=[
                # batch-tiled activations (lane-dense: padded to 128 features)
                pl.BlockSpec((block_b, d_in_p), lambda i: (i, 0)),
                # full, 128-aligned weight / bias blocks (resident every step)
                pl.BlockSpec((d_in_p, h1_p), lambda i: (0, 0)),
                pl.BlockSpec((1, h1_p), lambda i: (0, 0)),
                pl.BlockSpec((h1_p, h2_p), lambda i: (0, 0)),
                pl.BlockSpec((1, h2_p), lambda i: (0, 0)),
                pl.BlockSpec((h2_p, d_out_p), lambda i: (0, 0)),
                pl.BlockSpec((1, d_out_p), lambda i: (0, 0)),
            ],
            # lane-dense output (width 128); logical columns sliced in wrapper
            out_specs=pl.BlockSpec((block_b, d_out_p), lambda i: (i, 0)),
        ),
        compiler_params=pltpu.CompilerParams(
            dimension_semantics=("parallel",),  # shards batch tiles across TCs (v7x megacore)
        ),
    )(x_p, w1p, b1p, w2p, b2p, w3p, b3p)

    # VMEM footprint is tiny (<1 MiB even at block_b=512), safely under the
    # 32 MiB default scoped VMEM on all generations incl. v7x.
    return out_p[:B, :d_out]


def init_params(key, input_dimension, output_dimension, hidden=100):
    """Deterministic init mimicking torch.nn.Linear (U[-1/sqrt(fan_in), 1/sqrt(fan_in)])."""
    ks = jax.random.split(key, 6)

    def linear(kw, kb, fan_in, fan_out):
        bound = 1.0 / jnp.sqrt(jnp.float32(fan_in))
        w = jax.random.uniform(kw, (fan_in, fan_out), jnp.float32, -bound, bound)
        b = jax.random.uniform(kb, (1, fan_out), jnp.float32, -bound, bound)
        return w, b

    w1, b1 = linear(ks[0], ks[1], input_dimension, hidden)
    w2, b2 = linear(ks[2], ks[3], hidden, hidden)
    w3, b3 = linear(ks[4], ks[5], hidden, output_dimension)
    return (w1, b1, w2, b2, w3, b3)


def mlp_reference(x, params):
    w1, b1, w2, b2, w3, b3 = params
    h1 = jnp.maximum(x @ w1 + b1, 0.0)
    h2 = jnp.maximum(h1 @ w2 + b2, 0.0)
    return h2 @ w3 + b3


if __name__ == "__main__":
    key = jax.random.PRNGKey(0)
    k_params, k_x = jax.random.split(key)

    input_dimension = 4     # e.g. a small state vector
    output_dimension = 2    # e.g. Q-values for 2 actions
    batch = 32

    params = init_params(k_params, input_dimension, output_dimension)
    x = jax.random.normal(k_x, (batch, input_dimension), jnp.float32)

    fwd = jax.jit(mlp_forward)
    out = fwd(x, params)
    out = jax.block_until_ready(out)

    ref = mlp_reference(x, params)
    assert out.shape == (batch, output_dimension)
    assert jnp.allclose(out, ref, atol=1e-4, rtol=1e-4), "Pallas output mismatch vs reference"

    print("KERNEL_OK")
</pallas_src>

<mosaic_0001>
module attributes {stable_mosaic.version = 11 : i64} {
  func.func @mlp_kernel(%arg0: i32, %arg1: memref<32x128xf32, #tpu.memory_space<vmem>>, %arg2: memref<128x128xf32, #tpu.memory_space<vmem>>, %arg3: memref<1x128xf32, #tpu.memory_space<vmem>>, %arg4: memref<128x128xf32, #tpu.memory_space<vmem>>, %arg5: memref<1x128xf32, #tpu.memory_space<vmem>>, %arg6: memref<128x128xf32, #tpu.memory_space<vmem>>, %arg7: memref<1x128xf32, #tpu.memory_space<vmem>>, %arg8: memref<32x128xf32, #tpu.memory_space<vmem>>) attributes {dimension_semantics = [#tpu.dimension_semantics<parallel>], iteration_bounds = array<i64: 1>, scalar_prefetch = 0 : i64, scratch_operands = 0 : i64, tpu.core_type = #tpu.core_type<tc>, window_params = [{transform_indices = @transform_0, window_bounds = array<i64: 32, 128>}, {pipeline_mode = #tpu.pipeline_mode<synchronous>, transform_indices = @transform_1, window_bounds = array<i64: 128, 128>}, {pipeline_mode = #tpu.pipeline_mode<synchronous>, transform_indices = @transform_2, window_bounds = array<i64: 1, 128>}, {pipeline_mode = #tpu.pipeline_mode<synchronous>, transform_indices = @transform_3, window_bounds = array<i64: 128, 128>}, {pipeline_mode = #tpu.pipeline_mode<synchronous>, transform_indices = @transform_4, window_bounds = array<i64: 1, 128>}, {pipeline_mode = #tpu.pipeline_mode<synchronous>, transform_indices = @transform_5, window_bounds = array<i64: 128, 128>}, {pipeline_mode = #tpu.pipeline_mode<synchronous>, transform_indices = @transform_6, window_bounds = array<i64: 1, 128>}, {transform_indices = @transform_7, window_bounds = array<i64: 32, 128>}]} {
    %c0 = arith.constant 0 : index
    %c0_0 = arith.constant 0 : index
    %0 = vector.load %arg1[%c0, %c0_0] : memref<32x128xf32, #tpu.memory_space<vmem>>, vector<32x128xf32>
    %c0_1 = arith.constant 0 : index
    %c0_2 = arith.constant 0 : index
    %1 = vector.load %arg2[%c0_1, %c0_2] : memref<128x128xf32, #tpu.memory_space<vmem>>, vector<128x128xf32>
    %cst = arith.constant dense<0.000000e+00> : vector<32x128xf32>
    %2 = tpu.matmul %0, %1, %cst {dimension_numbers = #tpu.dot_dimension_numbers<[1], [0], [0], [1], [0, 0, 1, 1], [], []>} : vector<32x128xf32>, vector<128x128xf32>, vector<32x128xf32> -> vector<32x128xf32>
    %c0_3 = arith.constant 0 : index
    %c0_4 = arith.constant 0 : index
    %3 = vector.load %arg3[%c0_3, %c0_4] : memref<1x128xf32, #tpu.memory_space<vmem>>, vector<1x128xf32>
    %4 = vector.broadcast %3 : vector<1x128xf32> to vector<32x128xf32>
    %5 = arith.addf %2, %4 : vector<32x128xf32>
    %cst_5 = arith.constant 0.000000e+00 : f32
    %6 = vector.broadcast %cst_5 : f32 to vector<32x128xf32>
    %7 = arith.maximumf %5, %6 : vector<32x128xf32>
    %c0_6 = arith.constant 0 : index
    %c0_7 = arith.constant 0 : index
    %8 = vector.load %arg4[%c0_6, %c0_7] : memref<128x128xf32, #tpu.memory_space<vmem>>, vector<128x128xf32>
    %cst_8 = arith.constant dense<0.000000e+00> : vector<32x128xf32>
    %9 = tpu.matmul %7, %8, %cst_8 {dimension_numbers = #tpu.dot_dimension_numbers<[1], [0], [0], [1], [0, 0, 1, 1], [], []>} : vector<32x128xf32>, vector<128x128xf32>, vector<32x128xf32> -> vector<32x128xf32>
    %c0_9 = arith.constant 0 : index
    %c0_10 = arith.constant 0 : index
    %10 = vector.load %arg5[%c0_9, %c0_10] : memref<1x128xf32, #tpu.memory_space<vmem>>, vector<1x128xf32>
    %11 = vector.broadcast %10 : vector<1x128xf32> to vector<32x128xf32>
    %12 = arith.addf %9, %11 : vector<32x128xf32>
    %cst_11 = arith.constant 0.000000e+00 : f32
    %13 = vector.broadcast %cst_11 : f32 to vector<32x128xf32>
    %14 = arith.maximumf %12, %13 : vector<32x128xf32>
    %c0_12 = arith.constant 0 : index
    %c0_13 = arith.constant 0 : index
    %15 = vector.load %arg6[%c0_12, %c0_13] : memref<128x128xf32, #tpu.memory_space<vmem>>, vector<128x128xf32>
    %cst_14 = arith.constant dense<0.000000e+00> : vector<32x128xf32>
    %16 = tpu.matmul %14, %15, %cst_14 {dimension_numbers = #tpu.dot_dimension_numbers<[1], [0], [0], [1], [0, 0, 1, 1], [], []>} : vector<32x128xf32>, vector<128x128xf32>, vector<32x128xf32> -> vector<32x128xf32>
    %c0_15 = arith.constant 0 : index
    %c0_16 = arith.constant 0 : index
    %17 = vector.load %arg7[%c0_15, %c0_16] : memref<1x128xf32, #tpu.memory_space<vmem>>, vector<1x128xf32>
    %18 = vector.broadcast %17 : vector<1x128xf32> to vector<32x128xf32>
    %19 = arith.addf %16, %18 : vector<32x128xf32>
    %c0_17 = arith.constant 0 : index
    %c0_18 = arith.constant 0 : index
    %20 = vector.load %arg8[%c0_17, %c0_18] : memref<32x128xf32, #tpu.memory_space<vmem>>, vector<32x128xf32>
    tpu.vector_store %arg8[%c0_17, %c0_18], %19 {strides = array<i32>} : memref<32x128xf32, #tpu.memory_space<vmem>>, vector<32x128xf32>,
    return
  }
  func.func @transform_0(%arg0: i32) -> (i32, i32) {
    %c0_i32 = arith.constant 0 : i32
    %c0_i32_0 = arith.constant 0 : i32
    return %arg0, %c0_i32 : i32, i32
  }
  func.func @transform_1(%arg0: i32) -> (i32, i32) {
    %c0_i32 = arith.constant 0 : i32
    %c0_i32_0 = arith.constant 0 : i32
    %c0_i32_1 = arith.constant 0 : i32
    return %c0_i32, %c0_i32_0 : i32, i32
  }
  func.func @transform_2(%arg0: i32) -> (i32, i32) {
    %c0_i32 = arith.constant 0 : i32
    %c0_i32_0 = arith.constant 0 : i32
    %c0_i32_1 = arith.constant 0 : i32
    return %c0_i32, %c0_i32_0 : i32, i32
  }
  func.func @transform_3(%arg0: i32) -> (i32, i32) {
    %c0_i32 = arith.constant 0 : i32
    %c0_i32_0 = arith.constant 0 : i32
    %c0_i32_1 = arith.constant 0 : i32
    return %c0_i32, %c0_i32_0 : i32, i32
  }
  func.func @transform_4(%arg0: i32) -> (i32, i32) {
    %c0_i32 = arith.constant 0 : i32
    %c0_i32_0 = arith.constant 0 : i32
    %c0_i32_1 = arith.constant 0 : i32
    return %c0_i32, %c0_i32_0 : i32, i32
  }
  func.func @transform_5(%arg0: i32) -> (i32, i32) {
    %c0_i32 = arith.constant 0 : i32
    %c0_i32_0 = arith.constant 0 : i32
    %c0_i32_1 = arith.constant 0 : i32
    return %c0_i32, %c0_i32_0 : i32, i32
  }
  func.func @transform_6(%arg0: i32) -> (i32, i32) {
    %c0_i32 = arith.constant 0 : i32
    %c0_i32_0 = arith.constant 0 : i32
    %c0_i32_1 = arith.constant 0 : i32
    return %c0_i32, %c0_i32_0 : i32, i32
  }
  func.func @transform_7(%arg0: i32) -> (i32, i32) {
    %c0_i32 = arith.constant 0 : i32
    %c0_i32_0 = arith.constant 0 : i32
    return %arg0, %c0_i32 : i32, i32
  }
}

</mosaic_0001>

<bundles_post_ra>
// kernel: mlp_forward.1
= control target key start
LH: loop header
LB: loop body
LE: loop exit
PB: predicated region body
PF: predicated region fallthrough
CT: control target
= control target key end

     0   :  { %s876_s1 = inlined_call_operand.vmem [shape: f32[128,128], index: 1, kind: input, shape index: {}]   ;;  %s877_s0 = inlined_call_operand.vmem [shape: f32[32,128], index: 0, kind: input, shape index: {}]   ;;  %s878_s3 = inlined_call_operand.vmem [shape: f32[128,128], index: 3, kind: input, shape index: {}]   ;;  %s879_s5 = inlined_call_operand.vmem [shape: f32[128,128], index: 5, kind: input, shape index: {}]   ;;  %s880_s2 = inlined_call_operand.vmem [shape: f32[1,128], index: 2, kind: input, shape index: {}]   ;;  %s881_s4 = inlined_call_operand.vmem [shape: f32[1,128], index: 4, kind: input, shape index: {}]   ;;  %s882_s6 = inlined_call_operand.vmem [shape: f32[1,128], index: 6, kind: input, shape index: {}]   ;;  %s883_s7 = inlined_call_operand.vmem [shape: f32[32,128], index: 7, kind: output, shape index: {}]  }
   0x1   :  { %v30_v0 = vld [vmem:[%s876_s1] sm:$0xff]  ;;  %v31_v1 = vld [vmem:[%s876_s1 + $0x8] sm:$0xff]  ;;  %v32_v2 = vld [vmem:[%s876_s1 + $0x10] sm:$0xff] }
   0x2   :  { %v547_v3 = vpack.c.bf16 %v31_v1, %v30_v0  ;;  %v33_v4 = vld [vmem:[%s876_s1 + $0x18] sm:$0xff]  ;;  %v34_v6 = vld [vmem:[%s876_s1 + $0x20] sm:$0xff]  ;;  %v35_v7 = vld [vmem:[%s876_s1 + $0x28] sm:$0xff] }
   0x3   :  { %v551_v5 = vpack.c.bf16 %v33_v4, %v32_v2  ;;  %v555_v8 = vpack.c.bf16 %v35_v7, %v34_v6  ;;  %v26_v9 = vld [vmem:[%s877_s0] sm:$0xff]  ;;  %v36_v10 = vld [vmem:[%s876_s1 + $0x30] sm:$0xff]  ;;  %v37_v11 = vld [vmem:[%s876_s1 + $0x38] sm:$0xff] }
   0x4   :  { %548 = vmatprep.subr.bf16.mxu0 %v547_v3  ;;  %465 = vmatprep.mubr.f32.mxu0 %v26_v9  ;;  %v142_v12 = vld [vmem:[%s878_s3] sm:$0xff]  ;;  %v143_v13 = vld [vmem:[%s878_s3 + $0x8] sm:$0xff]  ;;  %v144_v14 = vld [vmem:[%s878_s3 + $0x10] sm:$0xff]  ;;  %v559_v18 = vpack.c.bf16 %v37_v11, %v36_v10 }
   0x5   :  { %550 = vmatpush3.bf16.msra.mxu0 %v547_v3  ;;  %v145_v15 = vld [vmem:[%s878_s3 + $0x18] sm:$0xff]  ;;  %v579_v16 = vpack.c.bf16 %v143_v13, %v142_v12  ;;  %v146_v19 = vld [vmem:[%s878_s3 + $0x20] sm:$0xff]  ;;  %v147_v20 = vld [vmem:[%s878_s3 + $0x28] sm:$0xff] }
   0x6   :  { %552 = vmatprep.subr.bf16.mxu0 %v551_v5  ;;  %v583_v17 = vpack.c.bf16 %v145_v15, %v144_v14  ;;  %v38_v21 = vld [vmem:[%s876_s1 + $0x40] sm:$0xff]  ;;  %v39_v22 = vld [vmem:[%s876_s1 + $0x48] sm:$0xff]  ;;  %v587_v23 = vpack.c.bf16 %v147_v20, %v146_v19  ;;  %v148_v25 = vld [vmem:[%s878_s3 + $0x30] sm:$0xff] }
   0x7   :  { %580 = vmatprep.subr.bf16.mxu1 %v579_v16  ;;  %v563_v24 = vpack.c.bf16 %v39_v22, %v38_v21  ;;  %v149_v26 = vld [vmem:[%s878_s3 + $0x38] sm:$0xff]  ;;  %v40_v27 = vld [vmem:[%s876_s1 + $0x50] sm:$0xff]  ;;  %v150_v31 = vld [vmem:[%s878_s3 + $0x40] sm:$0xff] }
   0x8   :  { %582 = vmatpush3.bf16.msra.mxu1 %v579_v16  ;;  %v41_v28 = vld [vmem:[%s876_s1 + $0x58] sm:$0xff]  ;;  %v591_v29 = vpack.c.bf16 %v149_v26, %v148_v25  ;;  %v151_v32 = vld [vmem:[%s878_s3 + $0x48] sm:$0xff]  ;;  %v42_v33 = vld [vmem:[%s876_s1 + $0x60] sm:$0xff] }
   0x9   :  { %554 = vmatpush3.bf16.msra.mxu0 %v551_v5  ;;  %584 = vmatprep.subr.bf16.mxu1 %v583_v17  ;;  %v567_v30 = vpack.c.bf16 %v41_v28, %v40_v27  ;;  %v43_v34 = vld [vmem:[%s876_s1 + $0x68] sm:$0xff]  ;;  %v595_v35 = vpack.c.bf16 %v151_v32, %v150_v31  ;;  %v152_v37 = vld [vmem:[%s878_s3 + $0x50] sm:$0xff]  ;;  %v153_v38 = vld [vmem:[%s878_s3 + $0x58] sm:$0xff] }
   0xa   :  { %556 = vmatprep.subr.bf16.mxu0 %v555_v8  ;;  %v571_v36 = vpack.c.bf16 %v43_v34, %v42_v33  ;;  %v44_v39 = vld [vmem:[%s876_s1 + $0x70] sm:$0xff]  ;;  %v45_v40 = vld [vmem:[%s876_s1 + $0x78] sm:$0xff]  ;;  %v599_v41 = vpack.c.bf16 %v153_v38, %v152_v37  ;;  %v154_v43 = vld [vmem:[%s878_s3 + $0x60] sm:$0xff] }
   0xb   :  { %v575_v42 = vpack.c.bf16 %v45_v40, %v44_v39  ;;  %v155_v44 = vld [vmem:[%s878_s3 + $0x68] sm:$0xff]  ;;  %v28_v47 = vld [vmem:[%s877_s0 + $0x10] sm:$0xff]  ;;  %v29_v48 = vld [vmem:[%s877_s0 + $0x18] sm:$0xff] }
   0xc   :  { %586 = vmatpush3.bf16.msra.mxu1 %v583_v17  ;;  %v603_v45 = vpack.c.bf16 %v155_v44, %v154_v43  ;;  %v27_v46 = vld [vmem:[%s877_s0 + $0x8] sm:$0xff]  ;;  %v156_v49 = vld [vmem:[%s878_s3 + $0x70] sm:$0xff]  ;;  %v157_v50 = vld [vmem:[%s878_s3 + $0x78] sm:$0xff] }
   0xd   :  { %558 = vmatpush3.bf16.msra.mxu0 %v555_v8  ;;  %588 = vmatprep.subr.bf16.mxu1 %v587_v23  ;;  %v607_v51 = vpack.c.bf16 %v157_v50, %v156_v49  ;;  %v254_v52 = vld [vmem:[%s879_s5] sm:$0xff]  ;;  %v255_v53 = vld [vmem:[%s879_s5 + $0x8] sm:$0xff]  ;;  %v256_v54 = vld [vmem:[%s879_s5 + $0x10] sm:$0xff] }
   0xe   :  { %560 = vmatprep.subr.bf16.mxu0 %v559_v18  ;;  %v611_v55 = vpack.c.bf16 %v255_v53, %v254_v52  ;;  %v257_v56 = vld [vmem:[%s879_s5 + $0x18] sm:$0xff]  ;;  %v258_v58 = vld [vmem:[%s879_s5 + $0x20] sm:$0xff]  ;;  %v259_v59 = vld [vmem:[%s879_s5 + $0x28] sm:$0xff] }
   0xf   :  { %v615_v57 = vpack.c.bf16 %v257_v56, %v256_v54  ;;  %v619_v60 = vpack.c.bf16 %v259_v59, %v258_v58  ;;  %v260_v61 = vld [vmem:[%s879_s5 + $0x30] sm:$0xff]  ;;  %v261_v62 = vld [vmem:[%s879_s5 + $0x38] sm:$0xff]  ;;  %v262_v0 = vld [vmem:[%s879_s5 + $0x40] sm:$0xff] }
  0x10   :  { %590 = vmatpush3.bf16.msra.mxu1 %v587_v23  ;;  %v623_v63 = vpack.c.bf16 %v261_v62, %v260_v61  ;;  %v263_v1 = vld [vmem:[%s879_s5 + $0x48] sm:$0xff]  ;;  %v264_v3 = vld [vmem:[%s879_s5 + $0x50] sm:$0xff]  ;;  %v265_v4 = vld [vmem:[%s879_s5 + $0x58] sm:$0xff] }
  0x11   :  { %562 = vmatpush3.bf16.msra.mxu0 %v559_v18  ;;  %592 = vmatprep.subr.bf16.mxu1 %v591_v29  ;;  %v627_v2 = vpack.c.bf16 %v263_v1, %v262_v0  ;;  %v631_v5 = vpack.c.bf16 %v265_v4, %v264_v3  ;;  %v266_v6 = vld [vmem:[%s879_s5 + $0x60] sm:$0xff]  ;;  %v267_v7 = vld [vmem:[%s879_s5 + $0x68] sm:$0xff]  ;;  %v268_v22 = vld [vmem:[%s879_s5 + $0x70] sm:$0xff] }
  0x12   :  { %564 = vmatprep.subr.bf16.mxu0 %v563_v24  ;;  %v635_v8 = vpack.c.bf16 %v267_v7, %v266_v6  ;;  %v370_v9 = vld [vmem:[%s880_s2] ss:$0 sm:$0xff]  ;;  %v269_v23 = vld [vmem:[%s879_s5 + $0x78] sm:$0xff] }
  0x13   :  { %v371_v25 = vld [vmem:[%s881_s4] ss:$0 sm:$0xff] }
  0x14   :  { %594 = vmatpush3.bf16.msra.mxu1 %v591_v29  ;;  %v372_v38 = vld [vmem:[%s882_s6] ss:$0 sm:$0xff] }
  0x15   :  { %566 = vmatpush3.bf16.msra.mxu0 %v563_v24  ;;  %596 = vmatprep.subr.bf16.mxu1 %v595_v35  ;;  %v639_v24 = vpack.c.bf16 %v269_v23, %v268_v22 }
  0x16   :  { %568 = vmatprep.subr.bf16.mxu0 %v567_v30 }
  0x18   :  { %598 = vmatpush3.bf16.msra.mxu1 %v595_v35 }
  0x19   :  { %570 = vmatpush3.bf16.msra.mxu0 %v567_v30  ;;  %600 = vmatprep.subr.bf16.mxu1 %v599_v41 }
  0x1a   :  { %572 = vmatprep.subr.bf16.mxu0 %v571_v36 }
  0x1c   :  { %602 = vmatpush3.bf16.msra.mxu1 %v599_v41 }
  0x1d   :  { %574 = vmatpush3.bf16.msra.mxu0 %v571_v36  ;;  %604 = vmatprep.subr.bf16.mxu1 %v603_v45 }
  0x1e   :  { %576 = vmatprep.subr.bf16.mxu0 %v575_v42 }
  0x20   :  { %606 = vmatpush3.bf16.msra.mxu1 %v603_v45 }
  0x21   :  { %578 = vmatpush3.bf16.msra.mxu0 %v575_v42  ;;  %608 = vmatprep.subr.bf16.mxu1 %v607_v51 }
  0x22   :  { %612 = vmatprep.subr.bf16.mxu0 %v611_v55 }
  0x24   :  { %466 = vmatmul.mubr.f32.vlgmr.msra.gmra.mrb[0].mxu0 %v27_v46  ;;  %610 = vmatpush3.bf16.msra.mxu1 %v607_v51 }
  0x25   :  { %468 = vmatprep.mubr.f32.mxu0 %v28_v47  ;;  %643 = vmatprep.subr.bf16.mxu1 %v611_v55 }
  0x26   :  { %614 = vmatpush3.bf16.msra.mxu0 %v611_v55 }
  0x27   :  { %616 = vmatprep.subr.bf16.mxu0 %v615_v57 }
  0x28   :  { %469 = vmatmul.mubr.f32.gmra.mrb[2].mxu0 %v29_v48 }
  0x2a   :  { %618 = vmatpush3.bf16.msra.mxu0 %v615_v57 }
  0x2b   :  { %620 = vmatprep.subr.bf16.mxu0 %v619_v60 }
  0x2e   :  { %622 = vmatpush3.bf16.msra.mxu0 %v619_v60 }
  0x2f   :  { %624 = vmatprep.subr.bf16.mxu0 %v623_v63 }
  0x32   :  { %626 = vmatpush3.bf16.msra.mxu0 %v623_v63 }
  0x33   :  { %628 = vmatprep.subr.bf16.mxu0 %v627_v2 }
  0x36   :  { %630 = vmatpush3.bf16.msra.mxu0 %v627_v2 }
  0x37   :  { %632 = vmatprep.subr.bf16.mxu0 %v631_v5 }
  0x3a   :  { %634 = vmatpush3.bf16.msra.mxu0 %v631_v5 }
  0x3b   :  { %636 = vmatprep.subr.bf16.mxu0 %v635_v8 }
  0x3e   :  { %638 = vmatpush3.bf16.msra.mxu0 %v635_v8 }
  0x3f   :  { %640 = vmatprep.subr.bf16.mxu0 %v639_v24 }
  0x42   :  { %642 = vmatpush3.bf16.msra.mxu0 %v639_v24 }
  0xf7   :  { %v467_v10 = vpop.f32.mrb[0].mxu0 }
  0xf8   :  { %v125_v11 = vadd.f32 %v467_v10, %v370_v9  ;;  %v119_v12 = vpop.f32.mrb[1].mxu0 }
  0xf9   :  { %v120_v13 = vadd.f32 %v370_v9, %v119_v12 }
  0xfa   :  { %v139_v16 = vmax.f32 %v125_v11, 0.0 }
  0xfb   :  { %v470_v14 = vpop.f32.mrb[2].mxu0  ;;  %v138_v15 = vmax.f32 %v120_v13, 0.0 }
  0xfc   :  { %v135_v17 = vadd.f32 %v470_v14, %v370_v9  ;;  %v129_v18 = vpop.f32.mrb[3].mxu0 }
  0xfd   :  { %v130_v19 = vadd.f32 %v370_v9, %v129_v18  ;;  %503 = vmatprep.mubr.f32.mxu1 %v138_v15 }
  0xfe   :  { %504 = vmatmul.mubr.f32.vlgmr.msra.gmra.mrb[0].mxu1 %v139_v16  ;;  %v141_v21 = vmax.f32 %v135_v17, 0.0 }
  0xff   :  { %v140_v20 = vmax.f32 %v130_v19, 0.0  ;;  %651 = vmatpush3.bf16.msra.mxu1 %v611_v55 }
 0x100   :  { %644 = vmatprep.subr.bf16.mxu1 %v615_v57 }
 0x101   :  { %506 = vmatprep.mubr.f32.mxu1 %v140_v20 }
 0x102   :  { %507 = vmatmul.mubr.f32.gmra.mrb[2].mxu1 %v141_v21 }
 0x103   :  { %652 = vmatpush3.bf16.msra.mxu1 %v615_v57 }
 0x104   :  { %645 = vmatprep.subr.bf16.mxu1 %v619_v60 }
 0x107   :  { %653 = vmatpush3.bf16.msra.mxu1 %v619_v60 }
 0x108   :  { %646 = vmatprep.subr.bf16.mxu1 %v623_v63 }
 0x10b   :  { %654 = vmatpush3.bf16.msra.mxu1 %v623_v63 }
 0x10c   :  { %647 = vmatprep.subr.bf16.mxu1 %v627_v2 }
 0x10f   :  { %655 = vmatpush3.bf16.msra.mxu1 %v627_v2 }
 0x110   :  { %648 = vmatprep.subr.bf16.mxu1 %v631_v5 }
 0x113   :  { %656 = vmatpush3.bf16.msra.mxu1 %v631_v5 }
 0x114   :  { %649 = vmatprep.subr.bf16.mxu1 %v635_v8 }
 0x117   :  { %657 = vmatpush3.bf16.msra.mxu1 %v635_v8 }
 0x118   :  { %650 = vmatprep.subr.bf16.mxu1 %v639_v24 }
 0x11b   :  { %658 = vmatpush3.bf16.msra.mxu1 %v639_v24 }
 0x1d1   :  { %v505_v26 = vpop.f32.mrb[0].mxu1 }
 0x1d2   :  { %v237_v27 = vadd.f32 %v505_v26, %v371_v25  ;;  %v231_v28 = vpop.f32.mrb[1].mxu1 }
 0x1d3   :  { %v232_v29 = vadd.f32 %v371_v25, %v231_v28 }
 0x1d4   :  { %v251_v32 = vmax.f32 %v237_v27, 0.0 }
 0x1d5   :  { %v250_v30 = vmax.f32 %v232_v29, 0.0  ;;  %v508_v31 = vpop.f32.mrb[2].mxu1 }
 0x1d6   :  { %v247_v33 = vadd.f32 %v508_v31, %v371_v25  ;;  %v241_v34 = vpop.f32.mrb[3].mxu1 }
 0x1d7   :  { %v242_v35 = vadd.f32 %v371_v25, %v241_v34  ;;  %541 = vmatprep.mubr.f32.mxu0 %v250_v30 }
 0x1d8   :  { %542 = vmatmul.mubr.f32.vlgmr.msra.gmra.mrb[4].mxu0 %v251_v32  ;;  %v253_v37 = vmax.f32 %v247_v33, 0.0 }
 0x1d9   :  { %v252_v36 = vmax.f32 %v242_v35, 0.0 }
 0x1db   :  { %544 = vmatprep.mubr.f32.mxu1 %v252_v36 }
 0x1dc   :  { %545 = vmatmul.mubr.f32.vlgmr.msra.gmra.mrb[4].mxu1 %v253_v37 }
 0x2ab   :  { %v543_v39 = vpop.f32.mrb[4].mxu0 }
 0x2ac   :  { %v349_v40 = vadd.f32 %v543_v39, %v372_v38  ;;  %v343_v41 = vpop.f32.mrb[5].mxu0 }
 0x2ad   :  { %v344_v42 = vadd.f32 %v372_v38, %v343_v41 }
 0x2ae   :  { %363 = vst [vmem:[%s883_s7 + $0x8] sm:$0xff] %v349_v40 }
 0x2af   :  { %362 = vst [vmem:[%s883_s7] sm:$0xff] %v344_v42  ;;  %v546_v43 = vpop.f32.mrb[4].mxu1 }
 0x2b0   :  { %v359_v44 = vadd.f32 %v546_v43, %v372_v38  ;;  %v353_v45 = vpop.f32.mrb[5].mxu1 }
 0x2b1   :  { %v354_v46 = vadd.f32 %v372_v38, %v353_v45 }
 0x2b2   :  { %365 = vst [vmem:[%s883_s7 + $0x18] sm:$0xff] %v359_v44 }
 0x2b3   :  { %364 = vst [vmem:[%s883_s7 + $0x10] sm:$0xff] %v354_v46 }

</bundles_post_ra>
